<compile_context>
chip_gen: v7x
topology: tpu7x:2x2x1
jax: 0.10.0
libtpu: 0.0.40
codegen_flags: <defaults>
</compile_context>

<pallas_src>
import functools

import jax
import jax.numpy as jnp
from jax.experimental import pallas as pl
from jax.experimental.pallas import tpu as pltpu

LANES = 128  # all layer widths are packed into 128-lane buffers


def _rup(x, m):
    return (x + m - 1) // m * m


def make_layout(num_input, para_1, para_2, para_3, num_output):
    """Row offsets of each parameter inside the two packed buffers."""
    assert max(num_input, para_1, para_2, para_3, num_output) <= LANES, \
        "packing assumes all layer widths <= 128"
    # bf16 weight buffer: 16-row-aligned segments, 128 lanes each.
    w_offs = {}
    r = 0
    w_offs["w1"] = r; r += _rup(num_input, 16)   # (num_input, 128)
    w_offs["w2"] = r; r += LANES                 # (128, 128), rows>=para_1 zero
    w_offs["w3"] = r; r += LANES                 # (128, 128), rows>=para_2 zero
    w_rows = r
    # f32 small buffer: one 8-row block per entry (row 0 meaningful).
    s_offs = {}
    r = 0
    for name in ("b1", "b2", "b3", "w4", "b4"):
        s_offs[name] = r; r += 8
    s_rows = r
    return w_offs, w_rows, s_offs, s_rows


def pack_params(params, dims):
    """Pack params once (amortized): weights -> one bf16 buffer (full tiles,
    zero padded), biases + w4 column 0 + b4 scalar -> one small f32 buffer."""
    num_input, para_1, para_2, para_3, num_output = dims
    w_offs, w_rows, s_offs, s_rows = make_layout(*dims)

    wbuf = jnp.zeros((w_rows, LANES), jnp.float32)
    wbuf = wbuf.at[w_offs["w1"]:w_offs["w1"] + num_input, :para_1].set(params["w1"])
    wbuf = wbuf.at[w_offs["w2"]:w_offs["w2"] + para_1, :para_2].set(params["w2"])
    wbuf = wbuf.at[w_offs["w3"]:w_offs["w3"] + para_2, :para_3].set(params["w3"])
    wbuf = wbuf.astype(jnp.bfloat16)

    sbuf = jnp.zeros((s_rows, LANES), jnp.float32)
    sbuf = sbuf.at[s_offs["b1"], :para_1].set(params["b1"][0])
    sbuf = sbuf.at[s_offs["b2"], :para_2].set(params["b2"][0])
    sbuf = sbuf.at[s_offs["b3"], :para_3].set(params["b3"][0])
    sbuf = sbuf.at[s_offs["w4"], :para_3].set(params["w4"][:, 0])  # column 0 only
    sbuf = sbuf.at[s_offs["b4"], 0].set(params["b4"][0, 0])
    return wbuf, sbuf


def make_mlp_kernel(dims):
    """Fused 4-layer MLP over one (TILE_B, num_input) batch tile, emitting only
    column 0 of the last Linear."""
    num_input, para_1, para_2, para_3, num_output = dims
    del para_1, para_2, num_output
    w_offs, _w_rows, s_offs, _s_rows = make_layout(*dims)
    w1o, w2o, w3o = w_offs["w1"], w_offs["w2"], w_offs["w3"]
    b1o, b2o, b3o = s_offs["b1"], s_offs["b2"], s_offs["b3"]
    w4o, b4o = s_offs["w4"], s_offs["b4"]
    del para_3  # zero padding in wbuf/sbuf makes the extra lanes contribute 0

    def kernel(x_ref, w_ref, s_ref, o_ref):
        # Layer 1: bf16 MXU matmul, f32 accumulate, bias + ReLU in f32.
        xb = x_ref[...].astype(jnp.bfloat16)                       # (TB, n_in)
        h = jnp.dot(xb, w_ref[w1o:w1o + num_input, :],
                    preferred_element_type=jnp.float32)            # (TB, 128)
        h = jnp.maximum(h + s_ref[b1o:b1o + 1, :], 0.0)
        # Layer 2 (full-tile padded weights; padded cols/rows are zero).
        h = jnp.dot(h.astype(jnp.bfloat16), w_ref[w2o:w2o + LANES, :],
                    preferred_element_type=jnp.float32)
        h = jnp.maximum(h + s_ref[b2o:b2o + 1, :], 0.0)
        # Layer 3.
        h = jnp.dot(h.astype(jnp.bfloat16), w_ref[w3o:w3o + LANES, :],
                    preferred_element_type=jnp.float32)
        h = jnp.maximum(h + s_ref[b3o:b3o + 1, :], 0.0)
        # Layer 4, column 0 only: VPU multiply + lane reduce (no N=1 MXU push).
        out = jnp.sum(h * s_ref[w4o:w4o + 1, :], axis=-1, keepdims=True)
        out = out + s_ref[b4o:b4o + 1, 0:1]                        # (TB, 1)
        o_ref[...] = out.astype(o_ref.dtype)

    return kernel


@functools.partial(jax.jit, static_argnames=("dims", "tile_b"))
def model1_forward(x, wbuf, sbuf, *, dims, tile_b=None):
    """x: (B, num_input) f32.  wbuf/sbuf: packed parameter buffers.
    Returns (B,) == column 0 of the final Linear output."""
    num_input, para_1, para_2, para_3, num_output = dims
    _w_offs, w_rows, _s_offs, s_rows = make_layout(*dims)
    B = x.shape[0]

    if tile_b is None:
        tile_b = min(256, _rup(B, 8))       # small B -> single tile, no padding
    b_pad = _rup(B, tile_b)
    if b_pad != B:
        x = jnp.pad(x, ((0, b_pad - B), (0, 0)))
    num_tiles = b_pad // tile_b

    flops = 2 * b_pad * (num_input * para_1 + para_1 * para_2
                         + para_2 * para_3 + para_3)
    bytes_accessed = x.size * 4 + wbuf.size * 2 + sbuf.size * 4 + b_pad * 4

    out = pl.pallas_call(
        make_mlp_kernel(dims),
        out_shape=jax.ShapeDtypeStruct((b_pad, 1), jnp.float32),
        grid=(num_tiles,),
        in_specs=[
            # x streams one (TILE_B, num_input) tile per grid step.
            pl.BlockSpec((tile_b, num_input), lambda i: (i, 0)),
            # Packed params: constant block index -> DMA'd once, VMEM-resident.
            pl.BlockSpec((w_rows, LANES), lambda i: (0, 0)),
            pl.BlockSpec((s_rows, LANES), lambda i: (0, 0)),
        ],
        out_specs=pl.BlockSpec((tile_b, 1), lambda i: (i, 0)),
        compiler_params=pltpu.CompilerParams(
            dimension_semantics=("parallel",)),
        cost_estimate=pl.CostEstimate(
            flops=flops, transcendentals=0, bytes_accessed=bytes_accessed),
    )(x, wbuf, sbuf)

    # [:, 0] already computed in-kernel; just drop padding + the size-1 lane.
    return out[:B, 0]


def init_params(key, num_input, para_1, para_2, para_3, num_output):
    """Deterministic init mimicking nn.Linear's U(-1/sqrt(fan_in), 1/sqrt(fan_in)).
    Weights stored transposed vs. PyTorch, i.e. (in_features, out_features)."""
    layer_dims = [(num_input, para_1), (para_1, para_2),
                  (para_2, para_3), (para_3, num_output)]
    params = {}
    for i, (fan_in, fan_out) in enumerate(layer_dims, start=1):
        key, kw, kb = jax.random.split(key, 3)
        bound = 1.0 / (fan_in ** 0.5)
        params[f"w{i}"] = jax.random.uniform(
            kw, (fan_in, fan_out), jnp.float32, minval=-bound, maxval=bound)
        params[f"b{i}"] = jax.random.uniform(
            kb, (1, fan_out), jnp.float32, minval=-bound, maxval=bound)
    return params


def reference_forward(x, params):
    h = x
    for i in range(1, 4):
        h = jnp.maximum(h @ params[f"w{i}"] + params[f"b{i}"], 0.0)
    h = h @ params["w4"] + params["b4"]
    return h[:, 0]


if __name__ == "__main__":
    # Small shapes consistent with the module's forward: src is (batch, num_input).
    batch, num_input, para_1, para_2, para_3, num_output = 8, 32, 64, 48, 32, 16
    dims = (num_input, para_1, para_2, para_3, num_output)

    key = jax.random.PRNGKey(0)
    key, kx = jax.random.split(key)
    x = jax.random.normal(kx, (batch, num_input), jnp.float32)
    params = init_params(key, *dims)

    # Pack parameters once (amortized across forward calls in a serving loop).
    wbuf, sbuf = pack_params(params, dims)
    wbuf, sbuf = jax.block_until_ready((wbuf, sbuf))

    # Small single-tile path (B=8).
    out = jax.block_until_ready(model1_forward(x, wbuf, sbuf, dims=dims))
    ref = reference_forward(x, params)
    assert out.shape == (batch,), out.shape
    # bf16 MXU passes (f32 accumulate) -> relaxed tolerance vs. the f32 reference.
    assert jnp.allclose(out, ref, atol=5e-2, rtol=5e-2), (out, ref)

    # Batched/grid throughput path: 4 grid steps, params held VMEM-resident.
    key, kxb = jax.random.split(key)
    xb = jax.random.normal(kxb, (512, num_input), jnp.float32)
    out_b = jax.block_until_ready(
        model1_forward(xb, wbuf, sbuf, dims=dims, tile_b=128))
    ref_b = reference_forward(xb, params)
    assert out_b.shape == (512,), out_b.shape
    assert jnp.allclose(out_b, ref_b, atol=5e-2, rtol=5e-2)

    print("KERNEL_OK")
</pallas_src>

<mosaic_0001>
module attributes {stable_mosaic.version = 11 : i64} {
  func.func @kernel(%arg0: i32, %arg1: memref<8x32xf32, #tpu.memory_space<vmem>>, %arg2: memref<288x128xbf16, #tpu.memory_space<vmem>>, %arg3: memref<40x128xf32, #tpu.memory_space<vmem>>, %arg4: memref<8x1xf32, #tpu.memory_space<vmem>>) attributes {dimension_semantics = [#tpu.dimension_semantics<parallel>], iteration_bounds = array<i64: 1>, scalar_prefetch = 0 : i64, scratch_operands = 0 : i64, tpu.core_type = #tpu.core_type<tc>, window_params = [{transform_indices = @transform_0, window_bounds = array<i64: 8, 32>}, {pipeline_mode = #tpu.pipeline_mode<synchronous>, transform_indices = @transform_1, window_bounds = array<i64: 288, 128>}, {pipeline_mode = #tpu.pipeline_mode<synchronous>, transform_indices = @transform_2, window_bounds = array<i64: 40, 128>}, {transform_indices = @transform_3, window_bounds = array<i64: 8, 1>}]} {
    %c0 = arith.constant 0 : index
    %c0_0 = arith.constant 0 : index
    %0 = vector.load %arg1[%c0, %c0_0] : memref<8x32xf32, #tpu.memory_space<vmem>>, vector<8x32xf32>
    %1 = arith.truncf %0 : vector<8x32xf32> to vector<8x32xbf16>
    %c0_1 = arith.constant 0 : index
    %c0_2 = arith.constant 0 : index
    %2 = vector.load %arg2[%c0_1, %c0_2] : memref<288x128xbf16, #tpu.memory_space<vmem>>, vector<32x128xbf16>
    %cst = arith.constant dense<0.000000e+00> : vector<8x128xf32>
    %3 = tpu.matmul %1, %2, %cst {dimension_numbers = #tpu.dot_dimension_numbers<[1], [0], [0], [1], [0, 0, 1, 1], [], []>} : vector<8x32xbf16>, vector<32x128xbf16>, vector<8x128xf32> -> vector<8x128xf32>
    %c0_3 = arith.constant 0 : index
    %c0_4 = arith.constant 0 : index
    %4 = vector.load %arg3[%c0_3, %c0_4] : memref<40x128xf32, #tpu.memory_space<vmem>>, vector<1x128xf32>
    %5 = vector.broadcast %4 : vector<1x128xf32> to vector<8x128xf32>
    %6 = arith.addf %3, %5 : vector<8x128xf32>
    %cst_5 = arith.constant 0.000000e+00 : f32
    %7 = vector.broadcast %cst_5 : f32 to vector<8x128xf32>
    %8 = arith.maximumf %6, %7 : vector<8x128xf32>
    %9 = arith.truncf %8 : vector<8x128xf32> to vector<8x128xbf16>
    %c32 = arith.constant 32 : index
    %c0_6 = arith.constant 0 : index
    %10 = vector.load %arg2[%c32, %c0_6] : memref<288x128xbf16, #tpu.memory_space<vmem>>, vector<128x128xbf16>
    %cst_7 = arith.constant dense<0.000000e+00> : vector<8x128xf32>
    %11 = tpu.matmul %9, %10, %cst_7 {dimension_numbers = #tpu.dot_dimension_numbers<[1], [0], [0], [1], [0, 0, 1, 1], [], []>} : vector<8x128xbf16>, vector<128x128xbf16>, vector<8x128xf32> -> vector<8x128xf32>
    %c8 = arith.constant 8 : index
    %c0_8 = arith.constant 0 : index
    %12 = vector.load %arg3[%c8, %c0_8] : memref<40x128xf32, #tpu.memory_space<vmem>>, vector<1x128xf32>
    %13 = vector.broadcast %12 : vector<1x128xf32> to vector<8x128xf32>
    %14 = arith.addf %11, %13 : vector<8x128xf32>
    %cst_9 = arith.constant 0.000000e+00 : f32
    %15 = vector.broadcast %cst_9 : f32 to vector<8x128xf32>
    %16 = arith.maximumf %14, %15 : vector<8x128xf32>
    %17 = arith.truncf %16 : vector<8x128xf32> to vector<8x128xbf16>
    %c160 = arith.constant 160 : index
    %c0_10 = arith.constant 0 : index
    %18 = vector.load %arg2[%c160, %c0_10] : memref<288x128xbf16, #tpu.memory_space<vmem>>, vector<128x128xbf16>
    %cst_11 = arith.constant dense<0.000000e+00> : vector<8x128xf32>
    %19 = tpu.matmul %17, %18, %cst_11 {dimension_numbers = #tpu.dot_dimension_numbers<[1], [0], [0], [1], [0, 0, 1, 1], [], []>} : vector<8x128xbf16>, vector<128x128xbf16>, vector<8x128xf32> -> vector<8x128xf32>
    %c16 = arith.constant 16 : index
    %c0_12 = arith.constant 0 : index
    %20 = vector.load %arg3[%c16, %c0_12] : memref<40x128xf32, #tpu.memory_space<vmem>>, vector<1x128xf32>
    %21 = vector.broadcast %20 : vector<1x128xf32> to vector<8x128xf32>
    %22 = arith.addf %19, %21 : vector<8x128xf32>
    %cst_13 = arith.constant 0.000000e+00 : f32
    %23 = vector.broadcast %cst_13 : f32 to vector<8x128xf32>
    %24 = arith.maximumf %22, %23 : vector<8x128xf32>
    %c24 = arith.constant 24 : index
    %c0_14 = arith.constant 0 : index
    %25 = vector.load %arg3[%c24, %c0_14] : memref<40x128xf32, #tpu.memory_space<vmem>>, vector<1x128xf32>
    %26 = vector.broadcast %25 : vector<1x128xf32> to vector<8x128xf32>
    %27 = arith.mulf %24, %26 : vector<8x128xf32>
    %cst_15 = arith.constant dense<0.000000e+00> : vector<8xf32>
    %28 = vector.multi_reduction <add>, %27, %cst_15 [1] : vector<8x128xf32> to vector<8xf32>
    %29 = vector.shape_cast %28 : vector<8xf32> to vector<8x1xf32>
    %c32_16 = arith.constant 32 : index
    %c0_17 = arith.constant 0 : index
    %30 = vector.load %arg3[%c32_16, %c0_17] : memref<40x128xf32, #tpu.memory_space<vmem>>, vector<1x1xf32>
    %31 = vector.broadcast %30 : vector<1x1xf32> to vector<8x1xf32>
    %32 = arith.addf %29, %31 : vector<8x1xf32>
    %c0_18 = arith.constant 0 : index
    %c0_19 = arith.constant 0 : index
    %33 = vector.load %arg4[%c0_18, %c0_19] : memref<8x1xf32, #tpu.memory_space<vmem>>, vector<8x1xf32>
    tpu.vector_store %arg4[%c0_18, %c0_19], %32 {strides = array<i32>} : memref<8x1xf32, #tpu.memory_space<vmem>>, vector<8x1xf32>,
    return
  }
  func.func @transform_0(%arg0: i32) -> (i32, i32) {
    %c0_i32 = arith.constant 0 : i32
    %c0_i32_0 = arith.constant 0 : i32
    return %arg0, %c0_i32 : i32, i32
  }
  func.func @transform_1(%arg0: i32) -> (i32, i32) {
    %c0_i32 = arith.constant 0 : i32
    %c0_i32_0 = arith.constant 0 : i32
    %c0_i32_1 = arith.constant 0 : i32
    return %c0_i32, %c0_i32_0 : i32, i32
  }
  func.func @transform_2(%arg0: i32) -> (i32, i32) {
    %c0_i32 = arith.constant 0 : i32
    %c0_i32_0 = arith.constant 0 : i32
    %c0_i32_1 = arith.constant 0 : i32
    return %c0_i32, %c0_i32_0 : i32, i32
  }
  func.func @transform_3(%arg0: i32) -> (i32, i32) {
    %c0_i32 = arith.constant 0 : i32
    %c0_i32_0 = arith.constant 0 : i32
    return %arg0, %c0_i32 : i32, i32
  }
}

</mosaic_0001>

<bundles_post_ra>
// kernel: model1_forward.1
= control target key start
LH: loop header
LB: loop body
LE: loop exit
PB: predicated region body
PF: predicated region fallthrough
CT: control target
= control target key end

     0   :  { %8 = vsyncpa [#allocation3], 0  ;;  %s648_s0 = inlined_call_operand.hbm [shape: f32[8,32], index: 0, kind: input, shape index: {}]   ;;  %s649_s1 = inlined_call_operand.hbm [shape: bf16[288,128], index: 1, kind: input, shape index: {}]   ;;  %s650_s2 = inlined_call_operand.hbm [shape: f32[40,128], index: 2, kind: input, shape index: {}]   ;;  %s651_s3 = inlined_call_operand.vmem [shape: f32[8,1], index: 3, kind: output, shape index: {}]  }
   0x1   :  { %9 = vsyncpa [#allocation5], 0  ;;  %s556_s12 = smov [#allocation4]   ;;  %s486_s16 = scalar_lea.hbm %s649_s1, 2304 }
   0x2   :  { %s25_s13 = sshll.u32 %s556_s12, 4  ;;  %p487_p0 = scmp.ne.s32.totalorder %s649_s1, %s486_s16  ;;  %s26_s13 = int_to_ptr.vmem [resolvable:$true] %s25_s13 }
   0x3   :  { %p490_p1 = scmp.lt.u32.totalorder %s486_s16, %s649_s1 }
   0x5   :  { %p492_p2 = pnand %p490_p1, %p487_p0 }
   0x7   :  { %495 = shalt.err (!%p492_p2)
}
   0x8   :  { %s496_s21 = scalar_lea.vmem %s26_s13, 2304  ;;  %p501_p4 = scmp.lt.s32.totalorder %s26_s13, %s26_s13 }
   0x9   :  { %p497_p3 = scmp.ne.s32.totalorder %s26_s13, %s496_s21  ;;  %p502_p5 = scmp.lt.s32.totalorder %s496_s21, %s496_s21 }
   0xb   :  { %p503_p6 = por %p502_p5, %p501_p4 }
   0xd   :  { %p504_p7 = pnand %p503_p6, %p497_p3 }
   0xf   :  { %507 = shalt.err (!%p504_p7)
}
  0x10   :  { %s557_s22 = smov 64   ;;  %s558_s23 = smov 4  }
  0x11   :  { %31 = dma.hbm_to_vmem [thread:$0]  %s649_s1, 2304, %s26_s13, [#allocation5], %s557_s22, %s557_s22, %s558_s23  }
  0x12   :  { %s559_s26 = smov [#allocation2]   ;;  %s560_s28 = smov [#allocation6]  }
  0x13   :  { %s16_s27 = sshll.u32 %s559_s26, 4  ;;  %s37_s29 = sshll.u32 %s560_s28, 4  ;;  %s17_s27 = int_to_ptr.vmem [resolvable:$true] %s16_s27  ;;  %s38_s29 = int_to_ptr.vmem [resolvable:$true] %s37_s29 }
  0x14   :  { %s508_s5 = scalar_lea.hbm %s648_s0, 128 }
  0x15   :  { %p509_p8 = scmp.ne.s32.totalorder %s648_s0, %s508_s5  ;;  %p512_p9 = scmp.lt.u32.totalorder %s508_s5, %s648_s0 }
  0x17   :  { %p514_p10 = pnand %p512_p9, %p509_p8 }
  0x19   :  { %517 = shalt.err (!%p514_p10)
}
  0x1a   :  { %s518_s1 = scalar_lea.vmem %s17_s27, 128  ;;  %p523_p12 = scmp.lt.s32.totalorder %s17_s27, %s17_s27 }
  0x1b   :  { %p519_p11 = scmp.ne.s32.totalorder %s17_s27, %s518_s1  ;;  %p524_p13 = scmp.lt.s32.totalorder %s518_s1, %s518_s1 }
  0x1d   :  { %p525_p0 = por %p524_p13, %p523_p12 }
  0x1f   :  { %p526_p1 = pnand %p525_p0, %p519_p11 }
  0x21   :  { %529 = shalt.err (!%p526_p1)
}
  0x22   :  { %19 = dma.hbm_to_vmem [thread:$0]  %s648_s0, 128, %s17_s27, [#allocation3]  }
  0x23   :  { %s530_s14 = scalar_lea.hbm %s650_s2, 640 }
  0x24   :  { %p531_p2 = scmp.ne.s32.totalorder %s650_s2, %s530_s14  ;;  %p534_p3 = scmp.lt.u32.totalorder %s530_s14, %s650_s2 }
  0x26   :  { %p536_p4 = pnand %p534_p3, %p531_p2 }
  0x28   :  { %539 = shalt.err (!%p536_p4)
}
  0x29   :  { %s540_s19 = scalar_lea.vmem %s38_s29, 640  ;;  %p545_p6 = scmp.lt.s32.totalorder %s38_s29, %s38_s29 }
  0x2a   :  { %p541_p5 = scmp.ne.s32.totalorder %s38_s29, %s540_s19  ;;  %p546_p7 = scmp.lt.s32.totalorder %s540_s19, %s540_s19 }
  0x2c   :  { %p547_p8 = por %p546_p7, %p545_p6 }
  0x2e   :  { %p548_p9 = pnand %p547_p8, %p541_p5 }
  0x30   :  { %551 = shalt.err (!%p548_p9)
}
  0x31   :  { %s561_s0 = smov 128   ;;  %s562_s20 = smov 8  }
  0x32   :  { %43 = dma.hbm_to_vmem [thread:$0]  %s650_s2, 640, %s38_s29, [#allocation5], %s561_s0, %s561_s0, %s562_s20  }
  0x33   :  { %552 = dma.done.wait [#allocation3], 128  }
  0x34   :  { %553 = vsyncadd [#allocation3], 4294967168 }
  0x35   :  { %554 = dma.done.wait [#allocation5], 2944  }
  0x36   :  { %555 = vsyncadd [#allocation5], 4294964352  ;;  %v563_v0 = vmov 0.0   ;;  %vm564_vm0 = vmmov 0   ;;  %v468_v1 = vld [vmem:[#allocation4] sm:$0xff]   ;;  %v469_v2 = vld [vmem:[#allocation4 + $0x8] sm:$0xff]  }
  0x37   :  { %411 = vmatprep.subr.bf16.mxu0 %v563_v0  ;;  %415 = vmatprep.mubr.msk.bf16.mxu0 %vm564_vm0, %v563_v0  ;;  %v54_v3 = vld [vmem:[#allocation2] sm:$0xff]  ;;  %v470_v4 = vld [vmem:[#allocation4 + $0x10] sm:$0xff]   ;;  %vm77_vm1 = vcmask 261120   ;;  %v472_v7 = vld [vmem:[#allocation4 + $0x20] sm:$0xff]   ;;  %vm358_vm2 = vcmask 7168  }
  0x38   :  { %419 = vmatprep.subr.bf16.mxu1 %v563_v0  ;;  %435 = vmatprep.mubr.msk.bf16.mxu1 %vm564_vm0, %v563_v0  ;;  %v55_v5 = vpack.c.bf16 %v54_v3, %v54_v3  ;;  %v471_v6 = vld [vmem:[#allocation4 + $0x18] sm:$0xff]   ;;  %v473_v8 = vld [vmem:[#allocation4 + $0x28] sm:$0xff]   ;;  %v474_v9 = vld [vmem:[#allocation4 + $0x30] sm:$0xff]  }
  0x39   :  { %412 = vmatpush3.bf16.msra.mxu0 %v468_v1  ;;  %420 = vmatpush3.bf16.msra.mxu1 %v470_v4  ;;  %v475_v10 = vld [vmem:[#allocation4 + $0x38] sm:$0xff]   ;;  %v476_v11 = vld [vmem:[#allocation4 + $0x40] sm:$0xff]   ;;  %v477_v12 = vld [vmem:[#allocation4 + $0x48] sm:$0xff]  }
  0x3a   :  { %413 = vmatprep.subr.bf16.mxu0 %v563_v0  ;;  %421 = vmatprep.subr.bf16.mxu1 %v563_v0  ;;  %v478_v13 = vld [vmem:[#allocation4 + $0x50] sm:$0xff]   ;;  %v479_v14 = vld [vmem:[#allocation4 + $0x58] sm:$0xff]   ;;  %v480_v15 = vld [vmem:[#allocation4 + $0x60] sm:$0xff]  }
  0x3b   :  { %v481_v16 = vld [vmem:[#allocation4 + $0x68] sm:$0xff]   ;;  %v482_v17 = vld [vmem:[#allocation4 + $0x70] sm:$0xff]   ;;  %v483_v18 = vld [vmem:[#allocation4 + $0x78] sm:$0xff]  }
  0x3c   :  { %v366_v19 = vld [vmem:[#allocation6] ss:$0 sm:$0xff]  ;;  %v484_v27 = vld [vmem:[#allocation4 + $0x80] sm:$0xff]   ;;  %v485_v28 = vld [vmem:[#allocation4 + $0x88] sm:$0xff]  }
  0x3d   :  { %414 = vmatpush3.bf16.msra.mxu0 %v469_v2  ;;  %422 = vmatpush3.bf16.msra.mxu1 %v471_v6  ;;  %v370_v29 = vld [vmem:[#allocation6 + $0x8] ss:$0 sm:$0xff]  ;;  %v379_v37 = vld [vmem:[#allocation6 + $0x10] ss:$0 sm:$0xff]  ;;  %v388_v42 = vld [vmem:[#allocation6 + $0x18] ss:$0 sm:$0xff] }
  0x3e   :  { %439 = vmatprep.subr.bf16.mxu0 %v563_v0  ;;  %423 = vmatprep.subr.bf16.mxu1 %v563_v0  ;;  %v389_v46 = vld [vmem:[#allocation6 + $0x20] ss:$0 sm:$0xff] }
  0x40   :  { %416 = vmatmul.mubr.msk.bf16.vlgmr.msra.gmra.mrb[0].mxu0 %vm77_vm1, %v55_v5 }
  0x41   :  { %455 = vmatprep.mubr.msk.bf16.mxu0 %vm564_vm0, %v563_v0  ;;  %424 = vmatpush3.bf16.msra.mxu1 %v472_v7 }
  0x42   :  { %425 = vmatprep.subr.bf16.mxu1 %v563_v0  ;;  %440 = vmatpush3.bf16.msra.mxu0 %v478_v13 }
  0x43   :  { %441 = vmatprep.subr.bf16.mxu0 %v563_v0 }
  0x45   :  { %426 = vmatpush3.bf16.msra.mxu1 %v473_v8 }
  0x46   :  { %427 = vmatprep.subr.bf16.mxu1 %v563_v0  ;;  %442 = vmatpush3.bf16.msra.mxu0 %v479_v14 }
  0x47   :  { %443 = vmatprep.subr.bf16.mxu0 %v563_v0 }
  0x49   :  { %428 = vmatpush3.bf16.msra.mxu1 %v474_v9 }
  0x4a   :  { %429 = vmatprep.subr.bf16.mxu1 %v563_v0  ;;  %444 = vmatpush3.bf16.msra.mxu0 %v480_v15 }
  0x4b   :  { %445 = vmatprep.subr.bf16.mxu0 %v563_v0 }
  0x4d   :  { %430 = vmatpush3.bf16.msra.mxu1 %v475_v10 }
  0x4e   :  { %431 = vmatprep.subr.bf16.mxu1 %v563_v0  ;;  %446 = vmatpush3.bf16.msra.mxu0 %v481_v16 }
  0x4f   :  { %447 = vmatprep.subr.bf16.mxu0 %v563_v0 }
  0x51   :  { %432 = vmatpush3.bf16.msra.mxu1 %v476_v11 }
  0x52   :  { %433 = vmatprep.subr.bf16.mxu1 %v563_v0  ;;  %448 = vmatpush3.bf16.msra.mxu0 %v482_v17 }
  0x53   :  { %449 = vmatprep.subr.bf16.mxu0 %v563_v0 }
  0x55   :  { %434 = vmatpush3.bf16.msra.mxu1 %v477_v12 }
  0x56   :  { %450 = vmatpush3.bf16.msra.mxu0 %v483_v18 }
  0x57   :  { %451 = vmatprep.subr.bf16.mxu0 %v563_v0 }
  0x5a   :  { %452 = vmatpush3.bf16.msra.mxu0 %v484_v27 }
  0x5b   :  { %453 = vmatprep.subr.bf16.mxu0 %v563_v0 }
  0x5e   :  { %454 = vmatpush3.bf16.msra.mxu0 %v485_v28 }
 0x113   :  { %v115_v20 = vpop.f32.mrb[0].mxu0 }
 0x114   :  { %v116_v21 = vadd.f32 %v366_v19, %v115_v20  ;;  %v417_v22 = vpop.f32.mrb[1].mxu0 }
 0x115   :  { %v118_v23 = vpop.f32.mrb[2].mxu0 }
 0x116   :  { %v121_v24 = vmax.f32 %v116_v21, 0.0  ;;  %v418_v25 = vpop.f32.mrb[3].mxu0 }
 0x118   :  { %v122_v26 = vpack.c.bf16 %v121_v24, %v121_v24 }
 0x11a   :  { %436 = vmatmul.mubr.bf16.vlgmr.msra.gmra.mrb[0].mxu1 %v122_v26 }
 0x1ed   :  { %v226_v30 = vpop.f32.mrb[0].mxu1 }
 0x1ee   :  { %v227_v31 = vadd.f32 %v370_v29, %v226_v30  ;;  %v437_v32 = vpop.f32.mrb[1].mxu1 }
 0x1ef   :  { %v229_v33 = vpop.f32.mrb[2].mxu1 }
 0x1f0   :  { %v232_v34 = vmax.f32 %v227_v31, 0.0  ;;  %v438_v35 = vpop.f32.mrb[3].mxu1 }
 0x1f2   :  { %v233_v36 = vpack.c.bf16 %v232_v34, %v232_v34 }
 0x1f4   :  { %456 = vmatmul.mubr.bf16.vlgmr.msra.gmra.mrb[4].mxu0 %v233_v36 }
 0x2c7   :  { %v337_v38 = vpop.f32.mrb[4].mxu0 }
 0x2c8   :  { %v338_v39 = vadd.f32 %v379_v37, %v337_v38  ;;  %v457_v40 = vpop.f32.mrb[5].mxu0 }
 0x2c9   :  { %v340_v41 = vpop.f32.mrb[6].mxu0 }
 0x2ca   :  { %v343_v43 = vmax.f32 %v338_v39, 0.0  ;;  %v458_v44 = vpop.f32.mrb[7].mxu0 }
 0x2cc   :  { %v349_v45 = vmul.f32 %v388_v42, %v343_v43 }
 0x2ce   :  { %350 = vadd.xlane.f32.xlu0 %v349_v45 }
 0x35b   :  { %v351_v47 = vpop.xlane.xlu0 %350 }
 0x35c   :  { %v357_v48 = vadd.f32 %v389_v46, %v351_v47 }
 0x35e   :  { %359 = vst.msk [vmem:[%s651_s3] sm:$0xff] %vm358_vm2, %v357_v48 }
 0x35f   :  { %364 = vsyncpa [#allocation3], 1 }
 0x360   :  { %365 = vsyncpa [#allocation5], 1 }

</bundles_post_ra>
